<compile_context>
chip_gen: v7x
topology: tpu7x:2x2x1
jax: 0.10.0
libtpu: 0.0.40
codegen_flags: <defaults>
</compile_context>

<pallas_src>
import functools

import numpy as np
import jax
import jax.numpy as jnp
from jax import lax
from jax.experimental import pallas as pl
from jax.experimental.pallas import tpu as pltpu


# ----------------------------------------------------------------------------
# helpers
# ----------------------------------------------------------------------------
def _round_up(x, m):
    return ((x + m - 1) // m) * m


def _largest_divisor_leq(n, cap):
    cap = max(1, min(n, cap))
    for d in range(cap, 0, -1):
        if n % d == 0:
            return d
    return 1


# ----------------------------------------------------------------------------
# Kernel 1: Hungarian-matcher pairwise cost
#   C = w_class * cost_class + w_mask * batch_sigmoid_bce + w_dice * batch_dice
# grid = (B, K) : B 'parallel' (megacore), K = tiles of the point axis ('arbitrary')
# ----------------------------------------------------------------------------
def _cost_kernel(pred_ref, tgt_ref, cls_ref, tsum_ref, out_ref,
                 acc_mm, acc_sig, acc_sp,
                 *, n_q, n_true, w_class, w_mask, w_dice):
    k = pl.program_id(1)
    n_k = pl.num_programs(1)

    @pl.when(k == 0)
    def _():
        acc_mm[...] = jnp.zeros_like(acc_mm)
        acc_sig[...] = jnp.zeros_like(acc_sig)
        acc_sp[...] = jnp.zeros_like(acc_sp)

    x = pred_ref[0].astype(jnp.float32)     # (n_q, TILE_N) mask logits
    t = tgt_ref[0]                          # (m,  TILE_N) bf16 binary targets

    # single EUP pass: e = exp(-|x|) feeds both sigmoid and softplus
    e = jnp.exp(-jnp.abs(x))
    inv1pe = pl.reciprocal(1.0 + e, approx=True)
    sig = jnp.where(x >= 0.0, inv1pe, e * inv1pe)        # sigmoid(x)
    sp = jnp.maximum(x, 0.0) + jnp.log1p(e)              # softplus(x) == BCE(x, 0)

    # one MXU push: [sigmoid(x) ; -x] @ t.T  (bf16 operands, f32 accumulate)
    lhs = jnp.concatenate([sig, -x], axis=0).astype(t.dtype)
    acc_mm[...] += lax.dot_general(lhs, t, (((1,), (1,)), ((), ())),
                                   preferred_element_type=jnp.float32)
    # XLU row reductions (free slot next to the matmul)
    acc_sig[...] += jnp.sum(sig, axis=1, keepdims=True)
    acc_sp[...] += jnp.sum(sp, axis=1, keepdims=True)

    @pl.when(k == n_k - 1)
    def _():
        mm = acc_mm[...]
        sig_t = mm[:n_q]        # sigmoid(x) @ t.T   (dice numerator / 2)
        negx_t = mm[n_q:]       # (-x) @ t.T
        # dice: 1 - (2*sig@t.T + 1) / (rowsum(sig) + rowsum(t) + 1)
        denom = acc_sig[...] + tsum_ref[0] + 1.0
        cost_dice = 1.0 - (2.0 * sig_t + 1.0) * pl.reciprocal(denom, approx=True)
        # bce: softplus(-x)@t.T + softplus(x)@(1-t).T == -x@t.T + rowsum(softplus(x))
        cost_bce = (negx_t + acc_sp[...]) * (1.0 / n_true)   # divide by the FULL N
        out_ref[0] = (w_class * cls_ref[0]
                      + w_mask * cost_bce
                      + w_dice * cost_dice)


def pairwise_match_cost(pred_masks, tgt_masks, cost_class, cost_weight,
                        *, tile_n=2048):
    """pred_masks (B,n_q,N) logits; tgt_masks (B,m,N) binary; cost_class (B,n_q,m).
    Returns the (B, n_q, m) matching-cost tensor."""
    B, n_q, N = pred_masks.shape
    m = tgt_masks.shape[1]

    # target row-sums over the full (unpadded) N, once, in the wrapper
    t_sum = jnp.sum(tgt_masks.astype(jnp.float32), axis=-1)[:, None, :]   # (B,1,m)

    # tile the point axis; pad logits with a large negative so sigmoid/softplus
    # of the padding are exactly 0, pad targets with 0 -> padding is inert.
    tile_n = max(128, min(int(tile_n), _round_up(N, 128)))
    n_pad = _round_up(N, tile_n)
    if n_pad != N:
        pred_masks = jnp.pad(pred_masks, ((0, 0), (0, 0), (0, n_pad - N)),
                             constant_values=-1e4)
        tgt_masks = jnp.pad(tgt_masks, ((0, 0), (0, 0), (0, n_pad - N)))
    k_steps = n_pad // tile_n

    # bf16 inputs: half the HBM->VMEM DMA bytes; binary targets exact in bf16;
    # MXU eats bf16 natively on v5e/v6e/v7x.  Per-step VMEM stays tiny, well
    # inside v7x's 64 MiB even with double-buffering.
    pred_bf = pred_masks.astype(jnp.bfloat16)
    tgt_bf = tgt_masks.astype(jnp.bfloat16)

    kern = functools.partial(
        _cost_kernel, n_q=n_q, n_true=float(N),
        w_class=float(cost_weight[0]), w_mask=float(cost_weight[1]),
        w_dice=float(cost_weight[2]))

    return pl.pallas_call(
        kern,
        out_shape=jax.ShapeDtypeStruct((B, n_q, m), jnp.float32),
        grid_spec=pltpu.PrefetchScalarGridSpec(
            num_scalar_prefetch=0,
            grid=(B, k_steps),
            in_specs=[
                pl.BlockSpec((1, n_q, tile_n), lambda b, k: (b, 0, k)),
                pl.BlockSpec((1, m, tile_n), lambda b, k: (b, 0, k)),
                pl.BlockSpec((1, n_q, m), lambda b, k: (b, 0, 0)),
                pl.BlockSpec((1, 1, m), lambda b, k: (b, 0, 0)),
            ],
            out_specs=pl.BlockSpec((1, n_q, m), lambda b, k: (b, 0, 0)),
            scratch_shapes=[
                pltpu.VMEM((2 * n_q, m), jnp.float32),   # [sig@t.T ; -x@t.T]
                pltpu.VMEM((n_q, 1), jnp.float32),       # rowsum(sigmoid(x))
                pltpu.VMEM((n_q, 1), jnp.float32),       # rowsum(softplus(x))
            ]),
        compiler_params=pltpu.CompilerParams(
            dimension_semantics=("parallel", "arbitrary")),
    )(pred_bf, tgt_bf, cost_class.astype(jnp.float32), t_sum)


# ----------------------------------------------------------------------------
# Kernel 2: boundary loss (Sobel gradient magnitude + BCE-with-logits mean)
# Lane-packed masks, column taps via pltpu.roll, one gridded call for all masks.
# ----------------------------------------------------------------------------
_SOBEL_X = ((-1.0, 0.0, 1.0), (-2.0, 0.0, 2.0), (-1.0, 0.0, 1.0))
_SOBEL_Y = ((-1.0, -2.0, -1.0), (0.0, 0.0, 0.0), (1.0, 2.0, 1.0))


def _grad_mag_packed(m):
    """Sobel gradient magnitude of an (H, Wp) slab of lane-packed masks.

    Rows are 'valid'-trimmed to H-2; column taps use pltpu.roll (XLU rotate)
    over the full packed width — wrapped / cross-mask values only land on
    mask-local boundary columns, which the caller masks out of the reduction.
    """
    H, Wp = m.shape
    rows = [m[i:i + H - 2, :] for i in range(3)]
    gx = jnp.zeros((H - 2, Wp), jnp.float32)
    gy = jnp.zeros((H - 2, Wp), jnp.float32)
    for i in range(3):
        for j in range(3):
            wx, wy = _SOBEL_X[i][j], _SOBEL_Y[i][j]
            if wx == 0.0 and wy == 0.0:
                continue
            dj = j - 1
            tap = rows[i] if dj == 0 else pltpu.roll(
                rows[i], shift=(-dj) % Wp, axis=1)
            if wx != 0.0:
                gx = gx + wx * tap
            if wy != 0.0:
                gy = gy + wy * tap
    return jnp.sqrt(gx * gx + gy * gy)


def _boundary_kernel(pred_ref, gt_ref, out_ref, *, W):
    pg = _grad_mag_packed(pred_ref[0].astype(jnp.float32))   # (H-2, Wp) logits
    gg = _grad_mag_packed(gt_ref[0].astype(jnp.float32))     # (H-2, Wp) "targets"
    # BCE-with-logits, stable form: max(x,0) - x*y + log1p(exp(-|x|))
    bce = jnp.maximum(pg, 0.0) - pg * gg + jnp.log1p(jnp.exp(-jnp.abs(pg)))
    # keep only interior columns of each lane-packed mask (valid 3x3 conv region)
    col = lax.broadcasted_iota(jnp.int32, bce.shape, 1) % W
    valid = (col >= 1) & (col <= W - 2)
    out_ref[0, 0] = jnp.sum(jnp.where(valid, bce, 0.0))


def _pack_masks(masks, pack):
    """(n, H, W) -> (n // pack, H, pack * W): groups of `pack` consecutive masks
    laid side-by-side along the 128-lane axis (lane-dense VPU layout)."""
    n, H, W = masks.shape
    g = n // pack
    return jnp.swapaxes(masks.reshape(g, pack, H, W), 1, 2).reshape(g, H, pack * W)


def boundary_loss_batched(pred_masks, gt_masks):
    """pred_masks, gt_masks: (B, n, H, W).  Returns the mean over B of the
    per-batch-element BCE-with-logits means (matches the reference loop)."""
    B, n, H, W = pred_masks.shape
    pack = _largest_divisor_leq(n, max(1, 128 // W))
    groups = n // pack
    wp = pack * W
    p = _pack_masks(pred_masks.reshape(B * n, H, W).astype(jnp.float32), pack)
    g = _pack_masks(gt_masks.reshape(B * n, H, W).astype(jnp.float32), pack)
    # TODO(synk): for large H/W, add a 1-pixel-halo spatial grid instead of
    # whole-slab VMEM residency (v7x has only 64 MiB of VMEM).
    sums = pl.pallas_call(
        functools.partial(_boundary_kernel, W=W),
        out_shape=jax.ShapeDtypeStruct((B * groups, 1), jnp.float32),
        grid_spec=pltpu.PrefetchScalarGridSpec(
            num_scalar_prefetch=0,
            grid=(B * groups,),
            in_specs=[pl.BlockSpec((1, H, wp), lambda i: (i, 0, 0)),
                      pl.BlockSpec((1, H, wp), lambda i: (i, 0, 0))],
            out_specs=pl.BlockSpec((1, 1), lambda i: (i, 0),
                                   memory_space=pltpu.MemorySpace.SMEM)),
        compiler_params=pltpu.CompilerParams(
            dimension_semantics=("parallel",)),
    )(p, g)
    per_batch = jnp.sum(sums.reshape(B, groups), axis=1)
    return jnp.mean(per_batch / float(n * (H - 2) * (W - 2)))


# ----------------------------------------------------------------------------
# EnhancedCriterion
# ----------------------------------------------------------------------------
class EnhancedCriterion:
    def __init__(self, ignore_label=-100, loss_weight=(1.0, 1.0, 1.0, 1.0),
                 cost_weight=(1.0, 1.0, 1.0), non_object_weight=0.1, num_class=18):
        # deterministic "buffers"
        self.class_weight = jnp.ones(num_class + 1, jnp.float32).at[-1].set(non_object_weight)
        self.loss_weight = jnp.asarray(loss_weight, jnp.float32)
        self.cost_weight = tuple(float(w) for w in cost_weight)
        self.num_class = num_class
        self.ignore_label = ignore_label
        self.boundary_weight = 0.5
        self.feature_weight = 0.3

    # ----- HungarianMatcher cost (Pallas, batched across B) -----
    def matcher_costs(self, pred_labels, pred_masks, insts):
        B, n_q = pred_labels.shape[0], pred_labels.shape[1]
        m = int(insts[0]['gt_labels'].shape[0])
        probs = jax.nn.softmax(pred_labels, axis=-1)                  # glue
        gt_labels = jnp.stack([i['gt_labels'] for i in insts])        # (B, m)
        idx = jnp.broadcast_to(gt_labels[:, None, :], (B, n_q, m))
        cost_class = -jnp.take_along_axis(probs, idx, axis=-1)        # (B, n_q, m)
        pred_flat = jnp.stack([mk.reshape(n_q, -1) for mk in pred_masks])
        tgt_flat = jnp.stack([i['gt_spmasks'].reshape(m, -1).astype(jnp.float32)
                              for i in insts])
        return pairwise_match_cost(pred_flat, tgt_flat, cost_class, self.cost_weight)

    # ----- base losses -----
    def compute_base_losses(self, pred, insts):
        ms = {int(i['gt_labels'].shape[0]) for i in insts}
        if len(ms) == 1 and next(iter(ms)) > 0:
            # one gridded call; batch axis shards across TensorCores (v7x)
            _C = self.matcher_costs(pred['labels'], pred['masks'], insts)
            # TODO(synk): linear_sum_assignment (Hungarian) is a host-side
            # combinatorial algorithm with no Pallas equivalent.
        else:
            for label_b, mask_b, inst in zip(pred['labels'], pred['masks'], insts):
                m = int(inst['gt_labels'].shape[0])
                if m == 0:
                    continue
                probs = jax.nn.softmax(label_b, axis=-1)
                cost_class = -probs[:, inst['gt_labels']]
                _C = pairwise_match_cost(
                    mask_b.reshape(mask_b.shape[0], -1)[None],
                    inst['gt_spmasks'].reshape(m, -1).astype(jnp.float32)[None],
                    cost_class[None], self.cost_weight)[0]
        # TODO(synk): compute_base_losses body is not defined in the reference
        # source file; returning zero for (cls, mask_bce, mask_dice, score).
        z = jnp.float32(0.0)
        return z, z, z, z

    # ----- feature embedding loss (plain JAX glue; data-dependent grouping) -----
    def compute_feature_loss(self, pred_features, instance_labels):
        labels_np = np.asarray(instance_labels)
        unique = np.unique(labels_np)
        feature_loss = jnp.float32(0.0)
        for inst_id in unique:
            if inst_id == self.ignore_label:
                continue
            idx = np.nonzero(labels_np == inst_id)[0]
            if idx.size == 0:
                continue
            inst_features = pred_features[idx]
            center = jnp.mean(inst_features, axis=0)
            pull_loss = jnp.mean(jnp.linalg.norm(inst_features - center, axis=1))
            push_loss = jnp.float32(0.0)
            for other_id in unique:
                if other_id == inst_id or other_id == self.ignore_label:
                    continue
                oidx = np.nonzero(labels_np == other_id)[0]
                other_center = jnp.mean(pred_features[oidx], axis=0)
                dist = jnp.linalg.norm(center - other_center)
                push_loss = push_loss + jnp.exp(-dist)
            feature_loss = feature_loss + pull_loss + push_loss
        return feature_loss / (len(unique) + 1e-06)

    # ----- forward -----
    def forward(self, pred, insts):
        class_loss, mask_bce_loss, mask_dice_loss, score_loss = \
            self.compute_base_losses(pred, insts)

        # boundary loss: one gridded pallas_call over all (batch, mask-group) slabs
        shapes = {tuple(mk.shape) for mk in pred['masks']}
        shapes |= {tuple(i['gt_spmasks'].shape) for i in insts}
        if len(shapes) == 1:
            pred_stack = jnp.stack(list(pred['masks']))
            gt_stack = jnp.stack([i['gt_spmasks'] for i in insts]).astype(jnp.float32)
            b_loss = boundary_loss_batched(pred_stack, gt_stack)
        else:
            b_loss = jnp.float32(0.0)
            for mk, inst in zip(pred['masks'], insts):
                b_loss = b_loss + boundary_loss_batched(
                    mk[None], inst['gt_spmasks'].astype(jnp.float32)[None])
            b_loss = b_loss / len(pred['masks'])

        f_loss = jnp.float32(0.0)
        if 'features' in pred:
            for features, inst in zip(pred['features'], insts):
                f_loss = f_loss + self.compute_feature_loss(
                    features, inst['gt_instance_labels'])
            f_loss = f_loss / len(pred['features'])

        loss = (self.loss_weight[0] * class_loss
                + self.loss_weight[1] * mask_bce_loss
                + self.loss_weight[2] * mask_dice_loss
                + self.loss_weight[3] * score_loss
                + self.boundary_weight * b_loss
                + self.feature_weight * f_loss)

        # single host transfer at the end (replaces per-term .item()/float()).
        host = jax.device_get({
            'cls_loss': class_loss, 'mask_bce_loss': mask_bce_loss,
            'mask_dice_loss': mask_dice_loss, 'score_loss': score_loss,
            'boundary_loss': b_loss, 'feature_loss': f_loss, 'loss': loss})
        loss_out = {k: float(v) for k, v in host.items()}
        return loss, loss_out


# ----------------------------------------------------------------------------
# main
# ----------------------------------------------------------------------------
if __name__ == "__main__":
    key = jax.random.PRNGKey(0)
    B, n_q, H, W = 2, 8, 16, 16
    num_class = 18
    P, D_feat = 64, 8

    keys = jax.random.split(key, 16)
    pred_labels = jax.random.normal(keys[0], (B, n_q, num_class + 1), jnp.float32)
    pred_masks = [jax.random.normal(keys[1 + b], (n_q, H, W), jnp.float32)
                  for b in range(B)]
    pred_features = [jax.random.normal(keys[3 + b], (P, D_feat), jnp.float32)
                     for b in range(B)]

    insts = []
    for b in range(B):
        gt_spmasks = (jax.random.uniform(keys[5 + b], (n_q, H, W)) > 0.5
                      ).astype(jnp.float32)
        gt_labels = jax.random.randint(keys[7 + b], (n_q,), 0, num_class)
        raw = np.asarray(jax.random.randint(keys[9 + b], (P,), 0, 4))
        gt_instance_labels = jnp.asarray(np.where(raw == 3, -100, raw))
        insts.append({
            'gt_labels': gt_labels,
            'gt_spmasks': gt_spmasks,
            'gt_instance_labels': gt_instance_labels,
        })

    pred = {'labels': pred_labels, 'masks': pred_masks, 'features': pred_features}

    criterion = EnhancedCriterion()
    loss, loss_out = criterion.forward(pred, insts)
    jax.block_until_ready(loss)
    print("KERNEL_OK")
</pallas_src>

<mosaic_0001>
module attributes {stable_mosaic.version = 11 : i64} {
  func.func @_cost_kernel(%arg0: i32, %arg1: i32, %arg2: memref<1x8x256xbf16, #tpu.memory_space<vmem>>, %arg3: memref<1x8x256xbf16, #tpu.memory_space<vmem>>, %arg4: memref<1x8x8xf32, #tpu.memory_space<vmem>>, %arg5: memref<1x1x8xf32, #tpu.memory_space<vmem>>, %arg6: memref<1x8x8xf32, #tpu.memory_space<vmem>>, %arg7: memref<16x8xf32, #tpu.memory_space<vmem>>, %arg8: memref<8x1xf32, #tpu.memory_space<vmem>>, %arg9: memref<8x1xf32, #tpu.memory_space<vmem>>) attributes {dimension_semantics = [#tpu.dimension_semantics<parallel>, #tpu.dimension_semantics<arbitrary>], iteration_bounds = array<i64: 2, 1>, scalar_prefetch = 0 : i64, scratch_operands = 3 : i64, tpu.core_type = #tpu.core_type<tc>, window_params = [{transform_indices = @transform_0, window_bounds = array<i64: 1, 8, 256>}, {transform_indices = @transform_1, window_bounds = array<i64: 1, 8, 256>}, {transform_indices = @transform_2, window_bounds = array<i64: 1, 8, 8>}, {transform_indices = @transform_3, window_bounds = array<i64: 1, 1, 8>}, {transform_indices = @transform_4, window_bounds = array<i64: 1, 8, 8>}]} {
    %c0_i32 = arith.constant 0 : i32
    %0 = arith.cmpi eq, %arg1, %c0_i32 : i32
    %1 = arith.extui %0 : i1 to i32
    %c0_i32_0 = arith.constant 0 : i32
    %2 = arith.cmpi ne, %1, %c0_i32_0 : i32
    scf.if %2 {
      %cst_27 = arith.constant 0.000000e+00 : f32
      %44 = vector.broadcast %cst_27 : f32 to vector<16x8xf32>
      %c0_28 = arith.constant 0 : index
      %c0_29 = arith.constant 0 : index
      %45 = vector.load %arg7[%c0_28, %c0_29] : memref<16x8xf32, #tpu.memory_space<vmem>>, vector<16x8xf32>
      tpu.vector_store %arg7[%c0_28, %c0_29], %44 {strides = array<i32>} : memref<16x8xf32, #tpu.memory_space<vmem>>, vector<16x8xf32>,
      %cst_30 = arith.constant 0.000000e+00 : f32
      %46 = vector.broadcast %cst_30 : f32 to vector<8x1xf32>
      %c0_31 = arith.constant 0 : index
      %c0_32 = arith.constant 0 : index
      %47 = vector.load %arg8[%c0_31, %c0_32] : memref<8x1xf32, #tpu.memory_space<vmem>>, vector<8x1xf32>
      tpu.vector_store %arg8[%c0_31, %c0_32], %46 {strides = array<i32>} : memref<8x1xf32, #tpu.memory_space<vmem>>, vector<8x1xf32>,
      %cst_33 = arith.constant 0.000000e+00 : f32
      %48 = vector.broadcast %cst_33 : f32 to vector<8x1xf32>
      %c0_34 = arith.constant 0 : index
      %c0_35 = arith.constant 0 : index
      %49 = vector.load %arg9[%c0_34, %c0_35] : memref<8x1xf32, #tpu.memory_space<vmem>>, vector<8x1xf32>
      tpu.vector_store %arg9[%c0_34, %c0_35], %48 {strides = array<i32>} : memref<8x1xf32, #tpu.memory_space<vmem>>, vector<8x1xf32>,
    } else {
    }
    %c0 = arith.constant 0 : index
    %c0_1 = arith.constant 0 : index
    %c0_2 = arith.constant 0 : index
    %3 = vector.load %arg2[%c0, %c0_1, %c0_2] : memref<1x8x256xbf16, #tpu.memory_space<vmem>>, vector<1x8x256xbf16>
    %4 = vector.shape_cast %3 : vector<1x8x256xbf16> to vector<8x256xbf16>
    %5 = arith.extf %4 : vector<8x256xbf16> to vector<8x256xf32>
    %c0_3 = arith.constant 0 : index
    %c0_4 = arith.constant 0 : index
    %c0_5 = arith.constant 0 : index
    %6 = vector.load %arg3[%c0_3, %c0_4, %c0_5] : memref<1x8x256xbf16, #tpu.memory_space<vmem>>, vector<1x8x256xbf16>
    %7 = vector.shape_cast %6 : vector<1x8x256xbf16> to vector<8x256xbf16>
    %8 = math.absf %5 : vector<8x256xf32>
    %cst = arith.constant 0.000000e+00 : f32
    %9 = vector.broadcast %cst : f32 to vector<8x256xf32>
    %10 = arith.subf %9, %8 : vector<8x256xf32>
    %11 = math.exp %10 : vector<8x256xf32>
    %cst_6 = arith.constant 1.000000e+00 : f32
    %12 = vector.broadcast %cst_6 : f32 to vector<8x256xf32>
    %13 = arith.addf %12, %11 : vector<8x256xf32>
    %14 = tpu.reciprocal %13 {approx = true} : vector<8x256xf32> -> vector<8x256xf32>
    %cst_7 = arith.constant 0.000000e+00 : f32
    %15 = vector.broadcast %cst_7 : f32 to vector<8x256xf32>
    %16 = arith.cmpf oge, %5, %15 : vector<8x256xf32>
    %17 = arith.mulf %11, %14 : vector<8x256xf32>
    %18 = arith.select %16, %14, %17 : vector<8x256xi1>, vector<8x256xf32>
    %cst_8 = arith.constant 0.000000e+00 : f32
    %19 = vector.broadcast %cst_8 : f32 to vector<8x256xf32>
    %20 = arith.maximumf %5, %19 : vector<8x256xf32>
    %21 = math.log1p %11 : vector<8x256xf32>
    %22 = arith.addf %20, %21 : vector<8x256xf32>
    %cst_9 = arith.constant 0.000000e+00 : f32
    %23 = vector.broadcast %cst_9 : f32 to vector<8x256xf32>
    %24 = arith.subf %23, %5 : vector<8x256xf32>
    %25 = tpu.concatenate %18, %24 in 0 : vector<8x256xf32>, vector<8x256xf32> -> vector<16x256xf32>
    %26 = arith.truncf %25 : vector<16x256xf32> to vector<16x256xbf16>
    %c0_10 = arith.constant 0 : index
    %c0_11 = arith.constant 0 : index
    %27 = vector.load %arg7[%c0_10, %c0_11] : memref<16x8xf32, #tpu.memory_space<vmem>>, vector<16x8xf32>
    %cst_12 = arith.constant dense<0.000000e+00> : vector<16x8xf32>
    %28 = tpu.matmul %26, %7, %cst_12 {dimension_numbers = #tpu.dot_dimension_numbers<[1], [1], [0], [0], [0, 0, 1, 0], [], []>} : vector<16x256xbf16>, vector<8x256xbf16>, vector<16x8xf32> -> vector<16x8xf32>
    %29 = arith.addf %27, %28 : vector<16x8xf32>
    %c0_13 = arith.constant 0 : index
    %c0_14 = arith.constant 0 : index
    %30 = vector.load %arg7[%c0_13, %c0_14] : memref<16x8xf32, #tpu.memory_space<vmem>>, vector<16x8xf32>
    tpu.vector_store %arg7[%c0_13, %c0_14], %29 {strides = array<i32>} : memref<16x8xf32, #tpu.memory_space<vmem>>, vector<16x8xf32>,
    %c0_15 = arith.constant 0 : index
    %c0_16 = arith.constant 0 : index
    %31 = vector.load %arg8[%c0_15, %c0_16] : memref<8x1xf32, #tpu.memory_space<vmem>>, vector<8x1xf32>
    %cst_17 = arith.constant dense<0.000000e+00> : vector<8xf32>
    %32 = vector.multi_reduction <add>, %18, %cst_17 [1] : vector<8x256xf32> to vector<8xf32>
    %33 = vector.shape_cast %32 : vector<8xf32> to vector<8x1xf32>
    %34 = arith.addf %31, %33 : vector<8x1xf32>
    %c0_18 = arith.constant 0 : index
    %c0_19 = arith.constant 0 : index
    %35 = vector.load %arg8[%c0_18, %c0_19] : memref<8x1xf32, #tpu.memory_space<vmem>>, vector<8x1xf32>
    tpu.vector_store %arg8[%c0_18, %c0_19], %34 {strides = array<i32>} : memref<8x1xf32, #tpu.memory_space<vmem>>, vector<8x1xf32>,
    %c0_20 = arith.constant 0 : index
    %c0_21 = arith.constant 0 : index
    %36 = vector.load %arg9[%c0_20, %c0_21] : memref<8x1xf32, #tpu.memory_space<vmem>>, vector<8x1xf32>
    %cst_22 = arith.constant dense<0.000000e+00> : vector<8xf32>
    %37 = vector.multi_reduction <add>, %22, %cst_22 [1] : vector<8x256xf32> to vector<8xf32>
    %38 = vector.shape_cast %37 : vector<8xf32> to vector<8x1xf32>
    %39 = arith.addf %36, %38 : vector<8x1xf32>
    %c0_23 = arith.constant 0 : index
    %c0_24 = arith.constant 0 : index
    %40 = vector.load %arg9[%c0_23, %c0_24] : memref<8x1xf32, #tpu.memory_space<vmem>>, vector<8x1xf32>
    tpu.vector_store %arg9[%c0_23, %c0_24], %39 {strides = array<i32>} : memref<8x1xf32, #tpu.memory_space<vmem>>, vector<8x1xf32>,
    %c0_i32_25 = arith.constant 0 : i32
    %41 = arith.cmpi eq, %arg1, %c0_i32_25 : i32
    %42 = arith.extui %41 : i1 to i32
    %c0_i32_26 = arith.constant 0 : i32
    %43 = arith.cmpi ne, %42, %c0_i32_26 : i32
    scf.if %43 {
      %c0_27 = arith.constant 0 : index
      %c0_28 = arith.constant 0 : index
      %44 = vector.load %arg7[%c0_27, %c0_28] : memref<16x8xf32, #tpu.memory_space<vmem>>, vector<16x8xf32>
      %45 = vector.extract_strided_slice %44 {offsets = [0, 0], sizes = [8, 8], strides = [1, 1]} : vector<16x8xf32> to vector<8x8xf32>
      %46 = vector.extract_strided_slice %44 {offsets = [8, 0], sizes = [8, 8], strides = [1, 1]} : vector<16x8xf32> to vector<8x8xf32>
      %c0_29 = arith.constant 0 : index
      %c0_30 = arith.constant 0 : index
      %47 = vector.load %arg8[%c0_29, %c0_30] : memref<8x1xf32, #tpu.memory_space<vmem>>, vector<8x1xf32>
      %c0_31 = arith.constant 0 : index
      %c0_32 = arith.constant 0 : index
      %c0_33 = arith.constant 0 : index
      %48 = vector.load %arg5[%c0_31, %c0_32, %c0_33] : memref<1x1x8xf32, #tpu.memory_space<vmem>>, vector<1x1x8xf32>
      %49 = vector.shape_cast %48 : vector<1x1x8xf32> to vector<1x8xf32>
      %50 = vector.broadcast %47 : vector<8x1xf32> to vector<8x8xf32>
      %51 = vector.broadcast %49 : vector<1x8xf32> to vector<8x8xf32>
      %52 = arith.addf %50, %51 : vector<8x8xf32>
      %cst_34 = arith.constant 1.000000e+00 : f32
      %53 = vector.broadcast %cst_34 : f32 to vector<8x8xf32>
      %54 = arith.addf %52, %53 : vector<8x8xf32>
      %cst_35 = arith.constant 2.000000e+00 : f32
      %55 = vector.broadcast %cst_35 : f32 to vector<8x8xf32>
      %56 = arith.mulf %55, %45 : vector<8x8xf32>
      %cst_36 = arith.constant 1.000000e+00 : f32
      %57 = vector.broadcast %cst_36 : f32 to vector<8x8xf32>
      %58 = arith.addf %56, %57 : vector<8x8xf32>
      %59 = tpu.reciprocal %54 {approx = true} : vector<8x8xf32> -> vector<8x8xf32>
      %60 = arith.mulf %58, %59 : vector<8x8xf32>
      %cst_37 = arith.constant 1.000000e+00 : f32
      %61 = vector.broadcast %cst_37 : f32 to vector<8x8xf32>
      %62 = arith.subf %61, %60 : vector<8x8xf32>
      %c0_38 = arith.constant 0 : index
      %c0_39 = arith.constant 0 : index
      %63 = vector.load %arg9[%c0_38, %c0_39] : memref<8x1xf32, #tpu.memory_space<vmem>>, vector<8x1xf32>
      %64 = vector.broadcast %63 : vector<8x1xf32> to vector<8x8xf32>
      %65 = arith.addf %46, %64 : vector<8x8xf32>
      %cst_40 = arith.constant 3.906250e-03 : f32
      %66 = vector.broadcast %cst_40 : f32 to vector<8x8xf32>
      %67 = arith.mulf %65, %66 : vector<8x8xf32>
      %c0_41 = arith.constant 0 : index
      %c0_42 = arith.constant 0 : index
      %c0_43 = arith.constant 0 : index
      %68 = vector.load %arg4[%c0_41, %c0_42, %c0_43] : memref<1x8x8xf32, #tpu.memory_space<vmem>>, vector<1x8x8xf32>
      %69 = vector.shape_cast %68 : vector<1x8x8xf32> to vector<8x8xf32>
      %cst_44 = arith.constant 1.000000e+00 : f32
      %70 = vector.broadcast %cst_44 : f32 to vector<8x8xf32>
      %71 = arith.mulf %70, %69 : vector<8x8xf32>
      %cst_45 = arith.constant 1.000000e+00 : f32
      %72 = vector.broadcast %cst_45 : f32 to vector<8x8xf32>
      %73 = arith.mulf %72, %67 : vector<8x8xf32>
      %74 = arith.addf %71, %73 : vector<8x8xf32>
      %cst_46 = arith.constant 1.000000e+00 : f32
      %75 = vector.broadcast %cst_46 : f32 to vector<8x8xf32>
      %76 = arith.mulf %75, %62 : vector<8x8xf32>
      %77 = arith.addf %74, %76 : vector<8x8xf32>
      %c0_47 = arith.constant 0 : index
      %c0_48 = arith.constant 0 : index
      %c0_49 = arith.constant 0 : index
      %78 = vector.load %arg6[%c0_47, %c0_48, %c0_49] : memref<1x8x8xf32, #tpu.memory_space<vmem>>, vector<1x8x8xf32>
      %79 = vector.shape_cast %78 : vector<1x8x8xf32> to vector<8x8xf32>
      %80 = vector.shape_cast %77 : vector<8x8xf32> to vector<1x8x8xf32>
      tpu.vector_store %arg6[%c0_47, %c0_48, %c0_49], %80 {strides = array<i32>} : memref<1x8x8xf32, #tpu.memory_space<vmem>>, vector<1x8x8xf32>,
    } else {
    }
    return
  }
  func.func @transform_0(%arg0: i32, %arg1: i32) -> (i32, i32, i32) {
    %c0_i32 = arith.constant 0 : i32
    %c0_i32_0 = arith.constant 0 : i32
    return %arg0, %c0_i32, %arg1 : i32, i32, i32
  }
  func.func @transform_1(%arg0: i32, %arg1: i32) -> (i32, i32, i32) {
    %c0_i32 = arith.constant 0 : i32
    %c0_i32_0 = arith.constant 0 : i32
    return %arg0, %c0_i32, %arg1 : i32, i32, i32
  }
  func.func @transform_2(%arg0: i32, %arg1: i32) -> (i32, i32, i32) {
    %c0_i32 = arith.constant 0 : i32
    %c0_i32_0 = arith.constant 0 : i32
    %c0_i32_1 = arith.constant 0 : i32
    return %arg0, %c0_i32, %c0_i32_0 : i32, i32, i32
  }
  func.func @transform_3(%arg0: i32, %arg1: i32) -> (i32, i32, i32) {
    %c0_i32 = arith.constant 0 : i32
    %c0_i32_0 = arith.constant 0 : i32
    %c0_i32_1 = arith.constant 0 : i32
    return %arg0, %c0_i32, %c0_i32_0 : i32, i32, i32
  }
  func.func @transform_4(%arg0: i32, %arg1: i32) -> (i32, i32, i32) {
    %c0_i32 = arith.constant 0 : i32
    %c0_i32_0 = arith.constant 0 : i32
    %c0_i32_1 = arith.constant 0 : i32
    return %arg0, %c0_i32, %c0_i32_0 : i32, i32, i32
  }
}

</mosaic_0001>

<bundles_post_ra>
// kernel: tpu_custom_call.1
= control target key start
LH: loop header
LB: loop body
LE: loop exit
PB: predicated region body
PF: predicated region fallthrough
CT: control target
= control target key end

     0   :  { %s1245_s0 = inlined_call_operand.hbm [shape: bf16[2,8,256], index: 0, kind: input, shape index: {}]   ;;  %s1246_s1 = inlined_call_operand.hbm [shape: bf16[2,8,256], index: 1, kind: input, shape index: {}]   ;;  %s1247_s2 = inlined_call_operand.hbm [shape: f32[2,8,8], index: 2, kind: input, shape index: {}]   ;;  %s1248_s3 = inlined_call_operand.vmem [shape: f32[2,1,8], index: 3, kind: input, shape index: {}]   ;;  %s1249_s4 = inlined_call_operand.hbm [shape: f32[2,8,8], index: 4, kind: output, shape index: {}]  }
   0x1   :  { %1258 = sst [smem:[#allocation19_spill]] %s1246_s1 }
   0x2   :  { %9 = vsyncpa [#allocation6], 0 }
   0x3   :  { %11 = vsyncpa [#allocation6 + $0x1], 0 }
   0x4   :  { %12 = vsyncpa [#allocation9], 0 }
   0x5   :  { %14 = vsyncpa [#allocation9 + $0x1], 0 }
   0x6   :  { %15 = vsyncpa [#allocation7], 0 }
   0x7   :  { %17 = vsyncpa [#allocation7 + $0x1], 0  ;;  %s963_s15 = smov 0   ;;  %s965_s16 = smov 0  }
   0x8   :  { %s967_s17 = smov 0   ;;  %s969_s18 = smov 0  }
   0x9   :  { %s971_s19 = smov 0   ;;  %s973_s20 = smov 0  }
   0xa LB: > { %1259 = sst [smem:[#allocation15_spill]] %s926_s19  ;;  %s994_s21 = sadd.s32 4294967295, %s930_s20   ;;  %s930_s20 = sphi %s973_s20, %s23_s20   ;;  %s926_s19 = sphi %s971_s19, %s1283_s19   ;;  %s922_s18 = sphi %s969_s18, %s1282_s18   ;;  %s918_s17 = sphi %s967_s17, %s1286_s17   ;;  %s914_s16 = sphi %s965_s16, %s1285_s16   ;;  %s910_s15 = sphi %s963_s15, %s1284_s15  }
   0xb   : > { %1260 = sst [smem:[#allocation16_spill]] %s930_s20  ;;  %s637_s22 = sadd.s32 4294967294, %s930_s20  }
   0xc   : > { %s35_s23 = sadd.s32 1, %s926_s19  ;;  %s44_s24 = sadd.s32 1, %s918_s17 }
   0xd   : > { %p37_p0 = scmp.ge.s32.totalorder %s35_s23, 2  ;;  %p51_p1 = scmp.ne.s32.totalorder %s918_s17, %s914_s16 }
   0xe   : > { %p52_p2 = scmp.eq.s32.totalorder %s930_s20, 0  ;;  %p57_p3 = scmp.ne.s32.totalorder %s914_s16, %s910_s15 }
   0xf   : > { %s1288_s23 = smov (%p37_p0, %s35_s23), 0  ;;  %p58_p5 = scmp.eq.s32.totalorder %s994_s21, 0 }
  0x10   : > { %1261 = sst [smem:[#allocation17_spill]] %s1288_s23  ;;  %p1006_p4 = por %p52_p2, %p51_p1 }
  0x11   : > { %s39_s26 = ssub.s32 %s926_s19, %s1288_s23  ;;  %p161_p6 = scmp.eq.s32.totalorder %s994_s21, 1 }
  0x12   : > { %p42_p7 = scmp.eq.s32.totalorder %s39_s26, 0  ;;  %p1014_p8 = por %p58_p5, %p57_p3 }
  0x13   : > { %p1018_p9 = por %p161_p6, %p51_p1  ;;  %p167_p10 = scmp.eq.s32.totalorder %s637_s22, 1 }
  0x14   : > { %s1263_s27 = scalar_select %p1014_p8, 1, 0 }
  0x15   : > { %s1264_s28 = scalar_select %p1018_p9, 1, 0 }
  0x16   : > { %s1023_s29 = scalar_select %p42_p7, %s918_s17, %s44_s24  }
  0x17   : > { %p1025_p11 = por %p167_p10, %p57_p3  ;;  %p684_p13 = scmp.lt.s32.totalorder %s930_s20, 2 }
  0x18   : > { %1265 = sst [smem:[#allocation18_spill]] %s1023_s29  ;;  %s1250_s5 = sand.u32 1, %s918_s17  }
  0x19   : > { %s1266_s30 = scalar_select %p1025_p11, 1, 0 }
  0x1a   : > { %s1034_s6 = sshll.u32 %s1250_s5, 3  ;;  %s1037_s7 = sshll.u32 %s926_s19, 7 }
  0x1b   : > { %p1041_p0 = pnand %p684_p13, %p1006_p4  ;;  %s208_s9 = sand.u32 1, %s930_s20  }
  0x1c   : > { %s1268_s1 = sld [smem:[#allocation19_spill]]  ;;  %s212_s13 = scalar_lea.vmem [#allocation8], %s1034_s6 }
  0x1d   : > { %s1267_s8 = scalar_select %p1041_p0, 1, 0 }
  0x1e   : > { %s222_s14 = sshll.u32 %s212_s13, 4  ;;  %s1057_s22 = scalar_lea.sflag [#allocation9], %s208_s9  ;;  %s1054_s14 = int_to_ptr.vmem [resolvable:$true] %s222_s14 }
  0x1f   : > { %p1063_p4 = pneg %p1041_p0 }
  0x22   : > { %s1050_s12 = scalar_lea.hbm %s1268_s1, %s1037_s7  ;;  %s759_s11 = scalar_lea.hbm %s1268_s1, 256 }
  0x23   : > { %s754_s24 = scalar_lea.hbm %s1050_s12, 128  ;;  %p760_p7 = scmp.lt.u32.totalorder %s1050_s12, %s1268_s1 }
  0x24   : > { %p755_p3 = scmp.ne.s32.totalorder %s1050_s12, %s754_s24  ;;  %p761_p10 = scmp.lt.u32.totalorder %s759_s11, %s754_s24 }
  0x25   : > { %p763_p12 = scmp.lt.u32.totalorder %s754_s24, %s1050_s12 }
  0x26   : > { %p757_p5 = pnand %p1063_p4, %p755_p3  ;;  %p762_p13 = por %p761_p10, %p760_p7 }
  0x28   : > { %p758_p6 = pneg %p757_p5  ;;  %p764_p1 = por %p763_p12, %p762_p13 }
  0x2a   : > { %p765_p2 = pnand %p764_p1, %p758_p6 }
  0x2c   : > { %768 = shalt.err (!%p765_p2)
}
  0x2d   : > { %s769_s9 = scalar_lea.vmem %s1054_s14, 128  ;;  %s932_s26 = smov [#allocation8]  }
  0x2e   : > { %p770_p3 = scmp.ne.s32.totalorder %s1054_s14, %s769_s9  ;;  %s774_s10 = sshll.u32 %s932_s26, 4  ;;  %s775_s10 = int_to_ptr.vmem [resolvable:$false] %s774_s10 }
  0x2f   : > { %s776_s5 = scalar_lea.vmem %s775_s10, 256  ;;  %p777_p9 = scmp.lt.s32.totalorder %s1054_s14, %s775_s10 }
  0x30   : > { %p772_p5 = pnand %p770_p3, %p1063_p4  ;;  %p778_p8 = scmp.lt.s32.totalorder %s776_s5, %s769_s9 }
  0x32   : > { %p773_p11 = pneg %p772_p5  ;;  %p779_p7 = por %p778_p8, %p777_p9 }
  0x34   : > { %p780_p10 = pnand %p779_p7, %p773_p11 }
  0x36   : > { %783 = shalt.err (!%p780_p10)
}
  0x37   : > { %676 = dma.hbm_to_vmem [thread:$0]  (!%p1041_p0), %s1050_s12, 128, %s1054_s14, %s1057_s22  }
  0x38   : > { %p1270_p12 = scmp.lt.s32.totalorder %s930_s20, 3  ;;  %p1271_p1 = scmp.ge.s32.totalorder %s930_s20, 1 }
  0x39   : > { %s1099_s9 = scalar_lea.hbm %s1245_s0, %s1037_s7  ;;  %s191_s26 = scalar_lea.vmem [#allocation5], %s1034_s6 }
  0x3a   : > { %p1091_p2 = pnand %p1271_p1, %p1270_p12  ;;  %s201_s10 = sshll.u32 %s191_s26, 4  ;;  %s1102_s10 = int_to_ptr.vmem [resolvable:$true] %s201_s10 }
  0x3b   : > { %s1108_s5 = scalar_lea.hbm %s1247_s2, %s1037_s7  ;;  %s1273_s1 = sand.u32 1, %s918_s17  }
  0x3c   : > { %s1272_s24 = scalar_select %p1091_p2, 1, 0 }
  0x3d   : > { %s188_s23 = scalar_lea.sflag [#allocation6], %s1273_s1  ;;  %s784_s19 = scalar_lea.hbm %s1099_s9, 128 }
  0x3e   : > { %p785_p8 = scmp.ne.s32.totalorder %s1099_s9, %s784_s19  ;;  %s789_s29 = scalar_lea.hbm %s1245_s0, 256 }
  0x3f   : > { %p790_p6 = scmp.lt.u32.totalorder %s1099_s9, %s1245_s0  ;;  %p791_p13 = scmp.lt.u32.totalorder %s789_s29, %s784_s19 }
  0x40   : > { %p787_p9 = pnand %p785_p8, %p1063_p4  ;;  %p793_p5 = scmp.lt.u32.totalorder %s784_s19, %s1099_s9 }
  0x41   : > { %p792_p3 = por %p791_p13, %p790_p6 }
  0x42   : > { %p788_p11 = pneg %p787_p9 }
  0x43   : > { %p794_p7 = por %p793_p5, %p792_p3 }
  0x45   : > { %p795_p10 = pnand %p794_p7, %p788_p11 }
  0x47   : > { %798 = shalt.err (!%p795_p10)
}
  0x48   : > { %s799_s1 = scalar_lea.vmem %s1102_s10, 128  ;;  %s933_s7 = smov [#allocation5]  }
  0x49   : > { %p800_p12 = scmp.ne.s32.totalorder %s1102_s10, %s799_s1  ;;  %s804_s12 = sshll.u32 %s933_s7, 4  ;;  %s805_s12 = int_to_ptr.vmem [resolvable:$false] %s804_s12 }
  0x4a   : > { %s806_s20 = scalar_lea.vmem %s805_s12, 256  ;;  %p807_p9 = scmp.lt.s32.totalorder %s1102_s10, %s805_s12 }
  0x4b   : > { %p802_p1 = pnand %p800_p12, %p1063_p4  ;;  %p808_p2 = scmp.lt.s32.totalorder %s806_s20, %s799_s1 }
  0x4d   : > { %p803_p8 = pneg %p802_p1  ;;  %p809_p6 = por %p808_p2, %p807_p9 }
  0x4f   : > { %p810_p13 = pnand %p809_p6, %p803_p8 }
  0x51   : > { %813 = shalt.err (!%p810_p13)
}
  0x52   : > { %673 = dma.hbm_to_vmem [thread:$0]  (!%p1041_p0), %s1099_s9, 128, %s1102_s10, %s188_s23  }
  0x53   : > { %s233_s19 = scalar_lea.vmem [#allocation10], %s1034_s6  ;;  %s814_s14 = scalar_lea.hbm %s1108_s5, 128 }
  0x54   : > { %s240_s29 = sshll.u32 %s233_s19, 4  ;;  %p815_p11 = scmp.ne.s32.totalorder %s1108_s5, %s814_s14  ;;  %s241_s29 = int_to_ptr.vmem [resolvable:$true] %s240_s29 }
  0x55   : > { %s819_s26 = scalar_lea.hbm %s1247_s2, 256  ;;  %p820_p5 = scmp.lt.u32.totalorder %s1108_s5, %s1247_s2 }
  0x56   : > { %p817_p2 = pnand %p815_p11, %p1063_p4  ;;  %p821_p7 = scmp.lt.u32.totalorder %s819_s26, %s814_s14 }
  0x57   : > { %p823_p12 = scmp.lt.u32.totalorder %s814_s14, %s1108_s5 }
  0x58   : > { %p818_p3 = pneg %p817_p2  ;;  %p822_p10 = por %p821_p7, %p820_p5 }
  0x5a   : > { %p824_p1 = por %p823_p12, %p822_p10 }
  0x5c   : > { %p825_p8 = pnand %p824_p1, %p818_p3 }
  0x5e   : > { %828 = shalt.err (!%p825_p8)
}
  0x5f   : > { %s829_s23 = scalar_lea.vmem %s241_s29, 128  ;;  %s934_s6 = smov [#allocation10]  }
  0x60   : > { %p830_p9 = scmp.ne.s32.totalorder %s241_s29, %s829_s23  ;;  %s834_s9 = sshll.u32 %s934_s6, 4  ;;  %s835_s9 = int_to_ptr.vmem [resolvable:$false] %s834_s9 }
  0x61   : > { %s836_s10 = scalar_lea.vmem %s835_s9, 256  ;;  %p837_p11 = scmp.lt.s32.totalorder %s241_s29, %s835_s9 }
  0x62   : > { %p832_p6 = pnand %p830_p9, %p1063_p4  ;;  %p838_p2 = scmp.lt.s32.totalorder %s836_s10, %s829_s23 }
  0x64   : > { %p833_p13 = pneg %p832_p6  ;;  %p839_p0 = por %p838_p2, %p837_p11 }
  0x66   : > { %p840_p5 = pnand %p839_p0, %p833_p13 }
  0x68   : > { %843 = shalt.err (!%p840_p5)
}
  0x69   : > { %p1274_p7 = scmp.ne.s32.totalorder %s1267_s8, 0  ;;  %p1275_p3 = scmp.ne.s32.totalorder %s1272_s24, 0 }
  0x6a   : > { %s1155_s25 = sand.u32 (!%p1275_p3), 1, %s914_s16   ;;  %p1276_p0 = scmp.ne.s32.totalorder (!%p1275_p3), %s1263_s27, 0 }
  0x6b   : > { %679 = dma.hbm_to_vmem [thread:$0]  (!%p1274_p7), %s1108_s5, 128, %s241_s29, %s1057_s22  }
  0x6c   : > { %255 = sbr.rel (%p1275_p3) target bundleno = 473 (0x1d9), region = 36  ;;  %s1158_s12 = sshll.u32 (!%p1275_p3), %s1155_s25, 3 }
  0x6d   : > { %s258_s20 = scalar_lea.sflag (!%p1275_p3), [#allocation6], %s1155_s25  ;;  %s261_s19 = scalar_lea.vmem (!%p1275_p3), [#allocation5], %s1158_s12 }
  0x73   : > { %897 = dma.done.wait (%p1276_p0), %s258_s20, 128  }
  0x74   : > { %899 = vsyncadd (%p1276_p0), %s258_s20, 4294967168  ;;  %s266_s8 = sand.u32 1, %s994_s21   ;;  %s270_s24 = scalar_lea.vmem [#allocation8], %s1158_s12 }
  0x75   : > { %s267_s22 = scalar_lea.sflag [#allocation9], %s266_s8 }
  0x76   : > { %901 = dma.done.wait (%p1276_p0), %s267_s22, 256  }
  0x77   : > { %903 = vsyncadd (%p1276_p0), %s267_s22, 4294967040  ;;  %vm330_vm0 = vcmask 7168   ;;  %v935_v0 = vmov 0.0   ;;  %v333_v1 = vld [vmem:[%s261_s19] sm:$0xff]  ;;  %v336_v2 = vld [vmem:[%s270_s24] sm:$0xff]  ;;  %v936_v47 = vmov 0  }
  0x78   : > { %331 = vst.msk [vmem:[#allocation3] sm:$0xff] %vm330_vm0, %v935_v0  ;;  %332 = vst.msk [vmem:[#allocation4] sm:$0xff] %vm330_vm0, %v935_v0  ;;  %v334_v3 = vunpack.c.l.bf16 %v333_v1  ;;  %v335_v4 = vunpack.c.h.bf16 %v333_v1  ;;  %v654_v5 = vcombine.high %v336_v2, %v336_v2  ;;  %v653_v6 = vcombine.low %v336_v2, %v336_v2  ;;  %736 = vset.pattern.permute.xlu1 %v936_v47  ;;  %p319_p4 = scmp.lt.s32.totalorder %s922_s18, 1  ;;  %s279_s14 = scalar_lea.vmem [#allocation10], %s1158_s12 }
  0x79   : > { %737 = vset.pattern.permute.xlu0 %v936_v47  ;;  %vm327_vm5 = vcmask 64512   ;;  %s657_s11 = sshll.u32 %s922_s18, 7  ;;  %s316_s13 = scalar_lea.vmem [#allocation11], %s1158_s12 }
  0x7a   : > { %v337_v7 = vand.u32 2147483647, %v334_v3  ;;  %v338_v8 = vand.u32 2147483647, %v335_v4  ;;  %390 = vmatprep.subr.bf16.mxu0 %v654_v5  ;;  %vm349_vm1 = vcmp.ge.f32.partialorder %v334_v3, 0.0  ;;  %v377_v24 = vsub.f32 0.0, %v334_v3  ;;  %s1195_s23 = scalar_lea.hbm %s1249_s4, %s657_s11 }
  0x7b   : > { %391 = vmatpush1.bf16.xpose.msra.mxu0 %v653_v6  ;;  %vm350_vm2 = vcmp.ge.f32.partialorder %v335_v4, 0.0  ;;  %v378_v28 = vsub.f32 0.0, %v335_v4  ;;  %v355_v31 = vmax.f32 %v334_v3, 0.0  ;;  %v356_v35 = vmax.f32 %v335_v4, 0.0  ;;  %328 = vst.msk [vmem:[#allocation2] sm:$0xff] %vm327_vm5, %v935_v0  ;;  %329 = vst.msk [vmem:[#allocation2 + $0x8] sm:$0xff] %vm327_vm5, %v935_v0 }
  0x7c   : > { %v339_v9 = vsub.f32 0.0, %v337_v7  ;;  %v340_v10 = vsub.f32 0.0, %v338_v8  ;;  %s320_s21 = scalar_select %p319_p4, %s922_s18, 1 }
  0x7d   : > { %s500_s26 = sshll.u32 %s316_s13, 4  ;;  %s487_s6 = scalar_lea.sflag [#allocation7], %s1155_s25  ;;  %s1197_s26 = int_to_ptr.vmem [resolvable:$true] %s500_s26 }
  0x7e   : > { %v341_v11 = vmul.f32 1.442695, %v339_v9  ;;  %v343_v12 = vmul.f32 1.442695, %v340_v10  ;;  %s321_s29 = scalar_lea.vmem %s1248_s3, %s320_s21  ;;  %s844_s9 = scalar_lea.vmem %s1197_s26, 128 }
  0x7f   : > { %v436_v48 = vld [vmem:[#allocation3] sm:$0xff]  ;;  %v443_v51 = vld [vmem:[#allocation4] sm:$0xff]  ;;  %v655_v0 = vld [vmem:[%s321_s29] ss:$0 sm:$0xff]  ;;  %p845_p10 = scmp.ne.s32.totalorder %s1197_s26, %s844_s9  ;;  %p1277_p12 = scmp.ne.s32.totalorder %s1264_s28, 0 }
  0x80   : > { %740 = vpow2.f32 %v341_v11  ;;  %s937_s18 = smov [#allocation11]  }
  0x81   : > { %742 = vpow2.f32 %v343_v12  ;;  %v482_v12 = vld [vmem:[%s279_s14] sm:$0xff]  ;;  %p846_p1 = pnand %p845_p10, %p1277_p12  ;;  %s848_s10 = sshll.u32 %s937_s18, 4  ;;  %s849_s10 = int_to_ptr.vmem [resolvable:$false] %s848_s10 }
  0x82   : > { %v381_v56 = vld [vmem:[#allocation2] sm:$0xff]  ;;  %v382_v58 = vld [vmem:[#allocation2 + $0x8] sm:$0xff]  ;;  %s850_s12 = scalar_lea.vmem %s849_s10, 256  ;;  %p851_p9 = scmp.lt.s32.totalorder %s1197_s26, %s849_s10 }
  0x83   : > { %p847_p8 = pneg %p846_p1  ;;  %p852_p6 = scmp.lt.s32.totalorder %s850_s12, %s844_s9 }
  0x85   : > { %p853_p13 = por %p852_p6, %p851_p9 }
  0x87   : > { %p854_p11 = pnand %p853_p13, %p847_p8 }
  0x8a   : > { %v741_v13 = vpop.eup %740 }
  0x8b   : > { %v743_v14 = vpop.eup %742  ;;  %v345_v15 = vadd.f32 1.0, %v741_v13  ;;  %v360_v17 = vmul.f32 -0.5, %v741_v13  ;;  %v363_v20 = vand.u32 2147483647, %v741_v13 }
  0x8c   : > { %v346_v16 = vadd.f32 1.0, %v743_v14  ;;  %v369_v18 = vmul.f32 -0.5, %v743_v14  ;;  %v372_v22 = vand.u32 2147483647, %v743_v14 }
  0x8d   : > { %744 = vrcp.f32 %v345_v15  ;;  %v361_v19 = vadd.f32 1.0, %v360_v17  ;;  %vm364_vm3 = vcmp.lt.f32.partialorder %v363_v20, 0.0004427343 }
  0x8e   : > { %746 = vrcp.f32 %v346_v16  ;;  %v370_v21 = vadd.f32 1.0, %v369_v18  ;;  %vm373_vm4 = vcmp.lt.f32.partialorder %v372_v22, 0.0004427343 }
  0x8f   : > { %748 = vlog2.f32 %v345_v15  ;;  %v362_v27 = vmul.f32 %v741_v13, %v361_v19 }
  0x90   : > { %750 = vlog2.f32 %v346_v16  ;;  %v371_v32 = vmul.f32 %v743_v14, %v370_v21 }
  0x97   : > { %v745_v23 = vpop.eup %744 }
  0x98   : > { %v747_v25 = vpop.eup %746  ;;  %v351_v26 = vmul.f32 %v745_v23, %v741_v13 }
  0x99   : > { %v749_v29 = vpop.eup %748  ;;  %v352_v30 = vmul.f32 %v747_v25, %v743_v14 }
  0x9a   : > { %v751_v33 = vpop.eup %750  ;;  %v353_v34 = vsel %vm349_vm1, %v745_v23, %v351_v26  ;;  %v359_v36 = vmul.f32 0.6931472, %v749_v29 }
  0x9b   : > { %v354_v37 = vsel %vm350_vm2, %v747_v25, %v352_v30  ;;  %v379_v38 = vpack.c.bf16 %v377_v24, %v353_v34  ;;  %v368_v39 = vmul.f32 0.6931472, %v751_v33 }
  0x9c   : > { %v437_v40 = vadd.f32 %v354_v37, %v353_v34  ;;  %v365_v41 = vsel %vm364_vm3, %v362_v27, %v359_v36  ;;  %v380_v42 = vpack.c.bf16 %v378_v28, %v354_v37 }
  0x9d   : > { %v374_v43 = vsel %vm373_vm4, %v371_v32, %v368_v39  ;;  %v375_v44 = vadd.f32 %v365_v41, %v355_v31 }
  0x9e   : > { %438 = vadd.xlane.f32.xlu0 %v437_v40  ;;  %v376_v45 = vadd.f32 %v374_v43, %v356_v35  ;;  %422 = vmatprep.mubr.bf16.mxu0 %v380_v42 }
  0x9f   : > { %423 = vmatmul.mubr.bf16.vlgmr.msra.gmra.mrb[0].mxu0 %v379_v38 }
  0xa0   : > { %v444_v46 = vadd.f32 %v376_v45, %v375_v44 }
  0xa2   : > { %445 = vadd.xlane.f32.xlu0 %v444_v46 }
 0x12b   : > { %v439_v49 = vpop.xlane.xlu0 %438 }
 0x12c   : > { %v440_v50 = vadd.f32 %v439_v49, %v436_v48 }
 0x12e   : > { %442 = vst.msk [vmem:[#allocation3] sm:$0xff] %vm330_vm0, %v440_v50 }
 0x12f   : > { %v446_v52 = vpop.xlane.xlu0 %445 }
 0x130   : > { %v447_v53 = vadd.f32 %v446_v52, %v443_v51 }
 0x132   : > { %448 = vst.msk [vmem:[#allocation4] sm:$0xff] %vm330_vm0, %v447_v53 }
 0x135   : > { %v454_v54 = vld [vmem:[#allocation3] sm:$0xff] }
 0x136   : > { %458 = vperm.xlu1 %736, %v454_v54  }
 0x139   : > { %v474_v55 = vld [vmem:[#allocation4] sm:$0xff] }
 0x13a   : > { %477 = vperm.xlu1 %736, %v474_v55  }
 0x172   : > { %v424_v57 = vpop.f32.mrb[0].mxu0 }
 0x173   : > { %v431_v59 = vadd.f32 %v424_v57, %v381_v56  ;;  %v426_v60 = vpop.f32.mrb[1].mxu0 }
 0x174   : > { %v427_v61 = vpop.f32.mrb[2].mxu0 }
 0x175   : > { %434 = vst.msk [vmem:[#allocation2] sm:$0xff] %vm327_vm5, %v431_v59  ;;  %v432_v62 = vadd.f32 %v427_v61, %v382_v58  ;;  %v429_v63 = vpop.f32.mrb[3].mxu0 }
 0x177   : > { %435 = vst.msk [vmem:[#allocation2 + $0x8] sm:$0xff] %vm327_vm5, %v432_v62 }
 0x17c   : > { %v452_v4 = vld [vmem:[#allocation2] sm:$0xff] }
 0x17d   : > { %v469_v7 = vmul.f32 2.0, %v452_v4 }
 0x17e   : > { %v453_v6 = vld [vmem:[#allocation2 + $0x8] sm:$0xff] }
 0x17f   : > { %v470_v9 = vadd.f32 1.0, %v469_v7 }
 0x1b5   : > { %v459_v1 = vpop.permute.xlu1 %458 }
 0x1b6   : > { %v467_v2 = vadd.f32 %v655_v0, %v459_v1 }
 0x1b8   : > { %v468_v3 = vadd.f32 1.0, %v467_v2 }
 0x1b9   : > { %v478_v5 = vpop.permute.xlu1 %477 }
 0x1ba   : > { %752 = vrcp.f32 %v468_v3  ;;  %v480_v8 = vadd.f32 %v478_v5, %v453_v6 }
 0x1bc   : > { %v481_v10 = vmul.f32 0.00390625, %v480_v8 }
 0x1be   : > { %v483_v15 = vadd.f32 %v482_v12, %v481_v10 }
 0x1c4   : > { %v753_v11 = vpop.eup %752 }
 0x1c5   : > { %v472_v13 = vmul.f32 %v753_v11, %v470_v9 }
 0x1c7   : > { %v473_v14 = vsub.f32 1.0, %v472_v13 }
 0x1c9   : > { %v484_v16 = vadd.f32 %v483_v15, %v473_v14 }
 0x1cb   : > { %485 = vst.msk [vmem:[%s316_s13] sm:$0xff] %vm327_vm5, %v484_v16 }
 0x1cc   : > { %857 = shalt.err (!%p854_p11)
}
 0x1cd   : > { %s858_s25 = scalar_lea.hbm %s1195_s23, 128  ;;  %s862_s8 = scalar_lea.hbm %s1249_s4, 256 }
 0x1ce   : > { %p859_p2 = scmp.ne.s32.totalorder %s1195_s23, %s858_s25  ;;  %p863_p3 = scmp.lt.u32.totalorder %s1195_s23, %s1249_s4 }
 0x1cf   : > { %p864_p0 = scmp.lt.u32.totalorder %s862_s8, %s858_s25  ;;  %p866_p10 = scmp.lt.u32.totalorder %s858_s25, %s1195_s23 }
 0x1d0   : > { %p860_p5 = pnand %p859_p2, %p1277_p12 }
 0x1d1   : > { %p865_p4 = por %p864_p0, %p863_p3 }
 0x1d2   : > { %p861_p7 = pneg %p860_p5 }
 0x1d3   : > { %p867_p1 = por %p866_p10, %p865_p4 }
 0x1d5   : > { %p868_p8 = pnand %p867_p1, %p861_p7 }
 0x1d7   : > { %871 = shalt.err (!%p868_p8)
}
 0x1d8   : > { %668 = dma.vmem_to_hbm [thread:$0]  (%p1277_p12), %s1197_s26, 128, %s1195_s23, %s487_s6  }
 0x1d9 PF: > { %s1278_s21 = sld [smem:[#allocation16_spill]]  ;;  %s512_s27 = sand.u32 1, %s910_s15  }
 0x1da   : > { %p1279_p9 = scmp.ne.s32.totalorder %s1266_s30, 0  ;;  %s513_s5 = scalar_lea.sflag [#allocation7], %s512_s27 }
 0x1df   : > { %p1280_p6 = scmp.ge.s32.totalorder %s1278_s21, 2 }
 0x1e1   : > { %p681_p13 = pnand %p1280_p6, %p1279_p9 }
 0x1e3   : > { %905 = dma.done.wait (!%p681_p13), %s513_s5, 128  }
 0x1e4   : > { %907 = vsyncadd (!%p681_p13), %s513_s5, 4294967168  ;;  %s23_s20 = sadd.s32 1, %s1278_s21   ;;  %s1281_s28 = sld [smem:[#allocation18_spill]] }
 0x1e5   : > { %p20_p11 = scmp.ge.s32.totalorder %s23_s20, 4   ;;  %s1282_s18 = sld [smem:[#allocation15_spill]] }
 0x1e6   : > { %s1283_s19 = sld [smem:[#allocation17_spill]]  ;;  %s1284_s15 = smov %s914_s16 }
 0x1e7   : > { %s1285_s16 = smov %s918_s17  ;;  %22 = sbr.rel (!%p20_p11) target bundleno = 10 (0xa), region = 116 }
 0x1ea   : > { %s1286_s17 = smov %s1281_s28 }
 0x1ee   :  { %518 = vsyncpa [#allocation6], 1 }
 0x1ef   :  { %520 = vsyncpa [#allocation6 + $0x1], 1 }
 0x1f0   :  { %521 = vsyncpa [#allocation9], 1 }
 0x1f1   :  { %523 = vsyncpa [#allocation9 + $0x1], 1 }
 0x1f2   :  { %524 = vsyncpa [#allocation7], 1 }
 0x1f3   :  { %526 = vsyncpa [#allocation7 + $0x1], 1 }

</bundles_post_ra>
